<compile_context>
chip_gen: v7x
topology: tpu7x:2x2x1
jax: 0.10.0
libtpu: 0.0.40
codegen_flags: <defaults>
</compile_context>

<pallas_src>
import jax
import jax.numpy as jnp
from jax.experimental import pallas as pl
from jax.experimental.pallas import tpu as pltpu

HIDDEN = 256


def _critic_kernel(sa_ref,
                   w14_ref, b14_ref,
                   w2_ref, b2_ref, w5_ref, b5_ref,
                   w3r_ref, w6r_ref, b36_ref,
                   q_ref):
    # Layer 1, both heads fused: (tb, D) @ (D, 512) -> f32 accumulate + bias + ReLU.
    h14 = jnp.dot(sa_ref[...], w14_ref[...],
                  preferred_element_type=jnp.float32) + b14_ref[...]
    h14 = jnp.maximum(h14, 0.0)
    h = h14[:, :HIDDEN]          # Q1 head activations (f32)
    g = h14[:, HIDDEN:]          # Q2 head activations (f32)

    # Layer 2 per head: 256x256 MXU matmuls (operands in compute dtype), f32 acc.
    h = jnp.maximum(
        jnp.dot(h.astype(w2_ref.dtype), w2_ref[...],
                preferred_element_type=jnp.float32) + b2_ref[...], 0.0)
    g = jnp.maximum(
        jnp.dot(g.astype(w5_ref.dtype), w5_ref[...],
                preferred_element_type=jnp.float32) + b5_ref[...], 0.0)

    # Output layer (256 -> 1 per head) off the MXU: f32 VPU multiply + lane-reduce.
    q1 = jnp.sum(h * w3r_ref[...], axis=-1, keepdims=True)      # (tb, 1)
    q2 = jnp.sum(g * w6r_ref[...], axis=-1, keepdims=True)      # (tb, 1)
    q = jnp.concatenate([q1, q2], axis=-1) + b36_ref[...]       # (tb, 2)
    q_ref[...] = q.astype(q_ref.dtype)


def prepare_critic_params(params, compute_dtype=jnp.bfloat16):
    """Fuse the 12 raw Linear params into the kernel layout.

    Call this ONCE per parameter update (it is hoisted out of critic_forward).
    Weights are stored (in, out) so the kernel computes y = x @ W + b.
    """
    (w1, b1, w2, b2, w3, b3, w4, b4, w5, b5, w6, b6) = params
    # Layer 1 of both heads fused along the output axis: (D, 512).
    w14 = jnp.concatenate([w1, w4], axis=1).astype(compute_dtype)
    b14 = jnp.concatenate([b1, b4]).reshape(1, -1).astype(jnp.float32)     # (1, 512)
    # Output layers kept in f32 as row vectors for the VPU/XLU reduce path.
    w3r = w3.reshape(1, -1).astype(jnp.float32)                            # (1, 256)
    w6r = w6.reshape(1, -1).astype(jnp.float32)                            # (1, 256)
    b36 = jnp.concatenate([b3, b6]).reshape(1, -1).astype(jnp.float32)     # (1, 2)
    return (w14, b14,
            w2.astype(compute_dtype), b2.reshape(1, -1).astype(jnp.float32),
            w5.astype(compute_dtype), b5.reshape(1, -1).astype(jnp.float32),
            w3r, w6r, b36)


def _batch_tiling(B, max_tile, row_align):
    """Pad B and pick a batch tile.

    - bf16 blocks use 16-row alignment (packed sublanes), f32 uses 8.
    - Moderate/large batches always get >= 2 grid steps so the "parallel" batch
      axis can be sharded across both v7x TensorCores.
    """
    max_tile = max(row_align, (max_tile // row_align) * row_align)
    if B <= row_align:
        return row_align, row_align                       # single tiny block
    steps = max(2, -(-B // max_tile))
    per_step = -(-B // steps)
    tb = -(-per_step // row_align) * row_align
    return steps * tb, tb


def critic_forward(state, action, fused_params, batch_tile=512):
    """Pallas implementation of Critic.forward: returns (q1, q2), each (B, 1) f32.

    `fused_params` is the tuple returned by prepare_critic_params (pre-fused,
    pre-cast; do not rebuild it per forward call).
    """
    (w14, b14, w2, b2, w5, b5, w3r, w6r, b36) = fused_params
    fused = (w14, b14, w2, b2, w5, b5, w3r, w6r, b36)
    B = state.shape[0]
    D = w14.shape[0]
    compute_dtype = w14.dtype
    row_align = 16 if jnp.dtype(compute_dtype).itemsize < 4 else 8

    pb, tb = _batch_tiling(B, batch_tile, row_align)

    # Single wrapper-side concat (D is tiny) -> one fused layer-1 MXU pass.
    sa = jnp.concatenate([state, action], axis=1).astype(compute_dtype)
    if pb != B:
        sa = jnp.pad(sa, ((0, pb - B), (0, 0)))

    def resident(x):
        # Whole-array block, same tile every grid step -> stays VMEM-resident.
        return pl.BlockSpec(x.shape, lambda i: (0,) * x.ndim)

    flops = 2 * pb * (D * 2 * HIDDEN + 2 * HIDDEN * HIDDEN + 2 * HIDDEN)
    weight_bytes = sum(int(x.size) * x.dtype.itemsize for x in fused)
    bytes_accessed = weight_bytes + pb * (D * sa.dtype.itemsize + 2 * 4)

    q = pl.pallas_call(
        _critic_kernel,
        grid=(pb // tb,),
        in_specs=[pl.BlockSpec((tb, D), lambda i: (i, 0))]
                 + [resident(x) for x in fused],
        out_specs=pl.BlockSpec((tb, 2), lambda i: (i, 0)),
        out_shape=jax.ShapeDtypeStruct((pb, 2), jnp.float32),
        compiler_params=pltpu.CompilerParams(
            dimension_semantics=("parallel",),
            vmem_limit_bytes=32 << 20,
        ),
        cost_estimate=pl.CostEstimate(
            flops=flops, transcendentals=0, bytes_accessed=bytes_accessed),
    )(sa, *fused)

    # Padded rows carry bias-only garbage -> slice before returning.
    q1 = q[:B, 0:1]
    q2 = q[:B, 1:2]
    return q1, q2


def init_critic_params(key, state_dim, action_dim, hidden=HIDDEN):
    """PyTorch nn.Linear default init: weight, bias ~ U(-1/sqrt(fan_in), +).
    Weights stored as (in, out) so y = x @ W + b."""
    in_dim = state_dim + action_dim
    dims = [(in_dim, hidden), (hidden, hidden), (hidden, 1),
            (in_dim, hidden), (hidden, hidden), (hidden, 1)]
    params = []
    for (fan_in, fan_out) in dims:
        key, kw, kb = jax.random.split(key, 3)
        bound = 1.0 / jnp.sqrt(jnp.float32(fan_in))
        w = jax.random.uniform(kw, (fan_in, fan_out), jnp.float32, -bound, bound)
        b = jax.random.uniform(kb, (fan_out,), jnp.float32, -bound, bound)
        params += [w, b]
    return tuple(params)


def critic_forward_ref(state, action, params):
    """Pure-JAX reference matching the PyTorch module."""
    sa = jnp.concatenate([state, action], axis=1).astype(jnp.float32)
    (w1, b1, w2, b2, w3, b3, w4, b4, w5, b5, w6, b6) = params
    h = jax.nn.relu(sa @ w1 + b1)
    h = jax.nn.relu(h @ w2 + b2)
    q1 = h @ w3 + b3
    g = jax.nn.relu(sa @ w4 + b4)
    g = jax.nn.relu(g @ w5 + b5)
    q2 = g @ w6 + b6
    return q1, q2


if __name__ == "__main__":
    key = jax.random.PRNGKey(0)
    fwd = jax.jit(critic_forward)

    # --- small toy case (matches the module's intended use), bf16 default path ---
    batch, state_dim, action_dim = 2, 8, 4
    key, ks, ka, kp = jax.random.split(key, 4)
    state = jax.random.normal(ks, (batch, state_dim), jnp.float32)
    action = jax.random.normal(ka, (batch, action_dim), jnp.float32)
    params = init_critic_params(kp, state_dim, action_dim)
    q1_ref, q2_ref = critic_forward_ref(state, action, params)

    fused_bf16 = prepare_critic_params(params, compute_dtype=jnp.bfloat16)  # hoisted
    q1, q2 = fwd(state, action, fused_bf16)
    jax.block_until_ready((q1, q2))
    assert q1.shape == (batch, 1) and q2.shape == (batch, 1)
    assert jnp.allclose(q1, q1_ref, atol=5e-2, rtol=5e-2)
    assert jnp.allclose(q2, q2_ref, atol=5e-2, rtol=5e-2)

    # --- same case, f32 MXU-operand path: tight tolerance vs the reference ---
    fused_f32 = prepare_critic_params(params, compute_dtype=jnp.float32)
    p1, p2 = fwd(state, action, fused_f32)
    jax.block_until_ready((p1, p2))
    assert jnp.allclose(p1, q1_ref, atol=1e-3, rtol=1e-3)
    assert jnp.allclose(p2, q2_ref, atol=1e-3, rtol=1e-3)

    # --- larger batch exercising padding + a multi-step grid (bf16 default) ---
    batch2, sdim2, adim2 = 300, 17, 6
    key, ks2, ka2, kp2 = jax.random.split(key, 4)
    state2 = jax.random.normal(ks2, (batch2, sdim2), jnp.float32)
    action2 = jax.random.normal(ka2, (batch2, adim2), jnp.float32)
    params2 = init_critic_params(kp2, sdim2, adim2)
    fused2 = prepare_critic_params(params2, compute_dtype=jnp.bfloat16)

    r1_ref, r2_ref = critic_forward_ref(state2, action2, params2)
    r1, r2 = fwd(state2, action2, fused2)
    jax.block_until_ready((r1, r2))
    assert r1.shape == (batch2, 1) and r2.shape == (batch2, 1)
    assert jnp.allclose(r1, r1_ref, atol=5e-2, rtol=5e-2)
    assert jnp.allclose(r2, r2_ref, atol=5e-2, rtol=5e-2)

    print("KERNEL_OK")
</pallas_src>

<mosaic_0001>
module attributes {stable_mosaic.version = 11 : i64} {
  func.func @_critic_kernel(%arg0: i32, %arg1: memref<16x12xbf16, #tpu.memory_space<vmem>>, %arg2: memref<12x512xbf16, #tpu.memory_space<vmem>>, %arg3: memref<1x512xf32, #tpu.memory_space<vmem>>, %arg4: memref<256x256xbf16, #tpu.memory_space<vmem>>, %arg5: memref<1x256xf32, #tpu.memory_space<vmem>>, %arg6: memref<256x256xbf16, #tpu.memory_space<vmem>>, %arg7: memref<1x256xf32, #tpu.memory_space<vmem>>, %arg8: memref<1x256xf32, #tpu.memory_space<vmem>>, %arg9: memref<1x256xf32, #tpu.memory_space<vmem>>, %arg10: memref<1x2xf32, #tpu.memory_space<vmem>>, %arg11: memref<16x2xf32, #tpu.memory_space<vmem>>) attributes {dimension_semantics = [#tpu.dimension_semantics<parallel>], iteration_bounds = array<i64: 1>, scalar_prefetch = 0 : i64, scratch_operands = 0 : i64, tpu.core_type = #tpu.core_type<tc>, window_params = [{transform_indices = @transform_0, window_bounds = array<i64: 16, 12>}, {pipeline_mode = #tpu.pipeline_mode<synchronous>, transform_indices = @transform_1, window_bounds = array<i64: 12, 512>}, {pipeline_mode = #tpu.pipeline_mode<synchronous>, transform_indices = @transform_2, window_bounds = array<i64: 1, 512>}, {pipeline_mode = #tpu.pipeline_mode<synchronous>, transform_indices = @transform_3, window_bounds = array<i64: 256, 256>}, {pipeline_mode = #tpu.pipeline_mode<synchronous>, transform_indices = @transform_4, window_bounds = array<i64: 1, 256>}, {pipeline_mode = #tpu.pipeline_mode<synchronous>, transform_indices = @transform_5, window_bounds = array<i64: 256, 256>}, {pipeline_mode = #tpu.pipeline_mode<synchronous>, transform_indices = @transform_6, window_bounds = array<i64: 1, 256>}, {pipeline_mode = #tpu.pipeline_mode<synchronous>, transform_indices = @transform_7, window_bounds = array<i64: 1, 256>}, {pipeline_mode = #tpu.pipeline_mode<synchronous>, transform_indices = @transform_8, window_bounds = array<i64: 1, 256>}, {pipeline_mode = #tpu.pipeline_mode<synchronous>, transform_indices = @transform_9, window_bounds = array<i64: 1, 2>}, {transform_indices = @transform_10, window_bounds = array<i64: 16, 2>}]} {
    %c0 = arith.constant 0 : index
    %c0_0 = arith.constant 0 : index
    %0 = vector.load %arg1[%c0, %c0_0] : memref<16x12xbf16, #tpu.memory_space<vmem>>, vector<16x12xbf16>
    %c0_1 = arith.constant 0 : index
    %c0_2 = arith.constant 0 : index
    %1 = vector.load %arg2[%c0_1, %c0_2] : memref<12x512xbf16, #tpu.memory_space<vmem>>, vector<12x512xbf16>
    %cst = arith.constant dense<0.000000e+00> : vector<16x512xf32>
    %2 = tpu.matmul %0, %1, %cst {dimension_numbers = #tpu.dot_dimension_numbers<[1], [0], [0], [1], [0, 0, 1, 1], [], []>} : vector<16x12xbf16>, vector<12x512xbf16>, vector<16x512xf32> -> vector<16x512xf32>
    %c0_3 = arith.constant 0 : index
    %c0_4 = arith.constant 0 : index
    %3 = vector.load %arg3[%c0_3, %c0_4] : memref<1x512xf32, #tpu.memory_space<vmem>>, vector<1x512xf32>
    %4 = vector.broadcast %3 : vector<1x512xf32> to vector<16x512xf32>
    %5 = arith.addf %2, %4 : vector<16x512xf32>
    %cst_5 = arith.constant 0.000000e+00 : f32
    %6 = vector.broadcast %cst_5 : f32 to vector<16x512xf32>
    %7 = arith.maximumf %5, %6 : vector<16x512xf32>
    %8 = vector.extract_strided_slice %7 {offsets = [0, 0], sizes = [16, 256], strides = [1, 1]} : vector<16x512xf32> to vector<16x256xf32>
    %9 = vector.extract_strided_slice %7 {offsets = [0, 256], sizes = [16, 256], strides = [1, 1]} : vector<16x512xf32> to vector<16x256xf32>
    %10 = arith.truncf %8 : vector<16x256xf32> to vector<16x256xbf16>
    %c0_6 = arith.constant 0 : index
    %c0_7 = arith.constant 0 : index
    %11 = vector.load %arg4[%c0_6, %c0_7] : memref<256x256xbf16, #tpu.memory_space<vmem>>, vector<256x256xbf16>
    %cst_8 = arith.constant dense<0.000000e+00> : vector<16x256xf32>
    %12 = tpu.matmul %10, %11, %cst_8 {dimension_numbers = #tpu.dot_dimension_numbers<[1], [0], [0], [1], [0, 0, 1, 1], [], []>} : vector<16x256xbf16>, vector<256x256xbf16>, vector<16x256xf32> -> vector<16x256xf32>
    %c0_9 = arith.constant 0 : index
    %c0_10 = arith.constant 0 : index
    %13 = vector.load %arg5[%c0_9, %c0_10] : memref<1x256xf32, #tpu.memory_space<vmem>>, vector<1x256xf32>
    %14 = vector.broadcast %13 : vector<1x256xf32> to vector<16x256xf32>
    %15 = arith.addf %12, %14 : vector<16x256xf32>
    %cst_11 = arith.constant 0.000000e+00 : f32
    %16 = vector.broadcast %cst_11 : f32 to vector<16x256xf32>
    %17 = arith.maximumf %15, %16 : vector<16x256xf32>
    %18 = arith.truncf %9 : vector<16x256xf32> to vector<16x256xbf16>
    %c0_12 = arith.constant 0 : index
    %c0_13 = arith.constant 0 : index
    %19 = vector.load %arg6[%c0_12, %c0_13] : memref<256x256xbf16, #tpu.memory_space<vmem>>, vector<256x256xbf16>
    %cst_14 = arith.constant dense<0.000000e+00> : vector<16x256xf32>
    %20 = tpu.matmul %18, %19, %cst_14 {dimension_numbers = #tpu.dot_dimension_numbers<[1], [0], [0], [1], [0, 0, 1, 1], [], []>} : vector<16x256xbf16>, vector<256x256xbf16>, vector<16x256xf32> -> vector<16x256xf32>
    %c0_15 = arith.constant 0 : index
    %c0_16 = arith.constant 0 : index
    %21 = vector.load %arg7[%c0_15, %c0_16] : memref<1x256xf32, #tpu.memory_space<vmem>>, vector<1x256xf32>
    %22 = vector.broadcast %21 : vector<1x256xf32> to vector<16x256xf32>
    %23 = arith.addf %20, %22 : vector<16x256xf32>
    %cst_17 = arith.constant 0.000000e+00 : f32
    %24 = vector.broadcast %cst_17 : f32 to vector<16x256xf32>
    %25 = arith.maximumf %23, %24 : vector<16x256xf32>
    %c0_18 = arith.constant 0 : index
    %c0_19 = arith.constant 0 : index
    %26 = vector.load %arg8[%c0_18, %c0_19] : memref<1x256xf32, #tpu.memory_space<vmem>>, vector<1x256xf32>
    %27 = vector.broadcast %26 : vector<1x256xf32> to vector<16x256xf32>
    %28 = arith.mulf %17, %27 : vector<16x256xf32>
    %cst_20 = arith.constant dense<0.000000e+00> : vector<16xf32>
    %29 = vector.multi_reduction <add>, %28, %cst_20 [1] : vector<16x256xf32> to vector<16xf32>
    %30 = vector.shape_cast %29 : vector<16xf32> to vector<16x1xf32>
    %c0_21 = arith.constant 0 : index
    %c0_22 = arith.constant 0 : index
    %31 = vector.load %arg9[%c0_21, %c0_22] : memref<1x256xf32, #tpu.memory_space<vmem>>, vector<1x256xf32>
    %32 = vector.broadcast %31 : vector<1x256xf32> to vector<16x256xf32>
    %33 = arith.mulf %25, %32 : vector<16x256xf32>
    %cst_23 = arith.constant dense<0.000000e+00> : vector<16xf32>
    %34 = vector.multi_reduction <add>, %33, %cst_23 [1] : vector<16x256xf32> to vector<16xf32>
    %35 = vector.shape_cast %34 : vector<16xf32> to vector<16x1xf32>
    %36 = tpu.concatenate %30, %35 in 1 : vector<16x1xf32>, vector<16x1xf32> -> vector<16x2xf32>
    %c0_24 = arith.constant 0 : index
    %c0_25 = arith.constant 0 : index
    %37 = vector.load %arg10[%c0_24, %c0_25] : memref<1x2xf32, #tpu.memory_space<vmem>>, vector<1x2xf32>
    %38 = vector.broadcast %37 : vector<1x2xf32> to vector<16x2xf32>
    %39 = arith.addf %36, %38 : vector<16x2xf32>
    %c0_26 = arith.constant 0 : index
    %c0_27 = arith.constant 0 : index
    %40 = vector.load %arg11[%c0_26, %c0_27] : memref<16x2xf32, #tpu.memory_space<vmem>>, vector<16x2xf32>
    tpu.vector_store %arg11[%c0_26, %c0_27], %39 {strides = array<i32>} : memref<16x2xf32, #tpu.memory_space<vmem>>, vector<16x2xf32>,
    return
  }
  func.func @transform_0(%arg0: i32) -> (i32, i32) {
    %c0_i32 = arith.constant 0 : i32
    %c0_i32_0 = arith.constant 0 : i32
    return %arg0, %c0_i32 : i32, i32
  }
  func.func @transform_1(%arg0: i32) -> (i32, i32) {
    %c0_i32 = arith.constant 0 : i32
    %c0_i32_0 = arith.constant 0 : i32
    %c0_i32_1 = arith.constant 0 : i32
    return %c0_i32, %c0_i32_0 : i32, i32
  }
  func.func @transform_2(%arg0: i32) -> (i32, i32) {
    %c0_i32 = arith.constant 0 : i32
    %c0_i32_0 = arith.constant 0 : i32
    %c0_i32_1 = arith.constant 0 : i32
    return %c0_i32, %c0_i32_0 : i32, i32
  }
  func.func @transform_3(%arg0: i32) -> (i32, i32) {
    %c0_i32 = arith.constant 0 : i32
    %c0_i32_0 = arith.constant 0 : i32
    %c0_i32_1 = arith.constant 0 : i32
    return %c0_i32, %c0_i32_0 : i32, i32
  }
  func.func @transform_4(%arg0: i32) -> (i32, i32) {
    %c0_i32 = arith.constant 0 : i32
    %c0_i32_0 = arith.constant 0 : i32
    %c0_i32_1 = arith.constant 0 : i32
    return %c0_i32, %c0_i32_0 : i32, i32
  }
  func.func @transform_5(%arg0: i32) -> (i32, i32) {
    %c0_i32 = arith.constant 0 : i32
    %c0_i32_0 = arith.constant 0 : i32
    %c0_i32_1 = arith.constant 0 : i32
    return %c0_i32, %c0_i32_0 : i32, i32
  }
  func.func @transform_6(%arg0: i32) -> (i32, i32) {
    %c0_i32 = arith.constant 0 : i32
    %c0_i32_0 = arith.constant 0 : i32
    %c0_i32_1 = arith.constant 0 : i32
    return %c0_i32, %c0_i32_0 : i32, i32
  }
  func.func @transform_7(%arg0: i32) -> (i32, i32) {
    %c0_i32 = arith.constant 0 : i32
    %c0_i32_0 = arith.constant 0 : i32
    %c0_i32_1 = arith.constant 0 : i32
    return %c0_i32, %c0_i32_0 : i32, i32
  }
  func.func @transform_8(%arg0: i32) -> (i32, i32) {
    %c0_i32 = arith.constant 0 : i32
    %c0_i32_0 = arith.constant 0 : i32
    %c0_i32_1 = arith.constant 0 : i32
    return %c0_i32, %c0_i32_0 : i32, i32
  }
  func.func @transform_9(%arg0: i32) -> (i32, i32) {
    %c0_i32 = arith.constant 0 : i32
    %c0_i32_0 = arith.constant 0 : i32
    %c0_i32_1 = arith.constant 0 : i32
    return %c0_i32, %c0_i32_0 : i32, i32
  }
  func.func @transform_10(%arg0: i32) -> (i32, i32) {
    %c0_i32 = arith.constant 0 : i32
    %c0_i32_0 = arith.constant 0 : i32
    return %arg0, %c0_i32 : i32, i32
  }
}

</mosaic_0001>

<bundles_post_ra>
// kernel: critic_forward.1
= control target key start
LH: loop header
LB: loop body
LE: loop exit
PB: predicated region body
PF: predicated region fallthrough
CT: control target
= control target key end

     0   :  { %15 = vsyncpa [#allocation3], 0  ;;  %s1195_s0 = inlined_call_operand.vmem [shape: bf16[16,12], index: 0, kind: input, shape index: {}]   ;;  %s1196_s1 = inlined_call_operand.hbm [shape: bf16[12,512], index: 1, kind: input, shape index: {}]   ;;  %s1197_s2 = inlined_call_operand.vmem [shape: f32[1,512], index: 2, kind: input, shape index: {}]   ;;  %s1198_s3 = inlined_call_operand.hbm [shape: bf16[256,256], index: 3, kind: input, shape index: {}]   ;;  %s1199_s4 = inlined_call_operand.vmem [shape: f32[1,256], index: 4, kind: input, shape index: {}]   ;;  %s1200_s5 = inlined_call_operand.hbm [shape: bf16[256,256], index: 5, kind: input, shape index: {}]   ;;  %s1201_s6 = inlined_call_operand.vmem [shape: f32[1,256], index: 6, kind: input, shape index: {}]   ;;  %s1202_s7 = inlined_call_operand.vmem [shape: f32[1,256], index: 7, kind: input, shape index: {}]   ;;  %s1203_s8 = inlined_call_operand.vmem [shape: f32[1,256], index: 8, kind: input, shape index: {}]   ;;  %s1204_s9 = inlined_call_operand.vmem [shape: f32[1,2], index: 9, kind: input, shape index: {}]   ;;  %s1205_s10 = inlined_call_operand.vmem [shape: f32[16,2], index: 10, kind: output, shape index: {}]  }
   0x1   :  { %16 = vsyncpa [#allocation5], 0  ;;  %s1063_s13 = smov [#allocation4]   ;;  %s993_s17 = scalar_lea.hbm %s1198_s3, 4096 }
   0x2   :  { %s38_s14 = sshll.u32 %s1063_s13, 4  ;;  %p994_p0 = scmp.ne.s32.totalorder %s1198_s3, %s993_s17  ;;  %s39_s14 = int_to_ptr.vmem [resolvable:$true] %s38_s14 }
   0x3   :  { %p997_p1 = scmp.lt.u32.totalorder %s993_s17, %s1198_s3 }
   0x5   :  { %p999_p2 = pnand %p997_p1, %p994_p0 }
   0x7   :  { %1002 = shalt.err (!%p999_p2)
}
   0x8   :  { %s1003_s22 = scalar_lea.vmem %s39_s14, 4096  ;;  %p1008_p4 = scmp.lt.s32.totalorder %s39_s14, %s39_s14 }
   0x9   :  { %p1004_p3 = scmp.ne.s32.totalorder %s39_s14, %s1003_s22  ;;  %p1009_p5 = scmp.lt.s32.totalorder %s1003_s22, %s1003_s22 }
   0xb   :  { %p1010_p6 = por %p1009_p5, %p1008_p4 }
   0xd   :  { %p1011_p7 = pnand %p1010_p6, %p1004_p3 }
   0xf   :  { %1014 = shalt.err (!%p1011_p7)
}
  0x10   :  { %s1064_s23 = smov 128   ;;  %s1065_s24 = smov 8  }
  0x11   :  { %44 = dma.hbm_to_vmem [thread:$0]  %s1198_s3, 4096, %s39_s14, [#allocation5], %s1064_s23, %s1064_s23, %s1065_s24  }
  0x12   :  { %s1066_s27 = smov [#allocation2]   ;;  %s1015_s11 = scalar_lea.hbm %s1196_s1, 512 }
  0x13   :  { %s24_s28 = sshll.u32 %s1066_s27, 4  ;;  %p1016_p8 = scmp.ne.s32.totalorder %s1196_s1, %s1015_s11  ;;  %s25_s28 = int_to_ptr.vmem [resolvable:$true] %s24_s28 }
  0x14   :  { %p1019_p9 = scmp.lt.u32.totalorder %s1015_s11, %s1196_s1 }
  0x16   :  { %p1021_p10 = pnand %p1019_p9, %p1016_p8 }
  0x18   :  { %1024 = shalt.err (!%p1021_p10)
}
  0x19   :  { %s1025_s17 = scalar_lea.vmem %s25_s28, 512  ;;  %p1030_p12 = scmp.lt.s32.totalorder %s25_s28, %s25_s28 }
  0x1a   :  { %p1026_p11 = scmp.ne.s32.totalorder %s25_s28, %s1025_s17  ;;  %p1031_p13 = scmp.lt.s32.totalorder %s1025_s17, %s1025_s17 }
  0x1c   :  { %p1032_p0 = por %p1031_p13, %p1030_p12 }
  0x1e   :  { %p1033_p1 = pnand %p1032_p0, %p1026_p11 }
  0x20   :  { %1036 = shalt.err (!%p1033_p1)
}
  0x21   :  { %s1067_s3 = smov 256   ;;  %s1068_s14 = smov 16  }
  0x22   :  { %30 = dma.hbm_to_vmem [thread:$0]  %s1196_s1, 512, %s25_s28, [#allocation3], %s1067_s3, %s1067_s3, %s1068_s14  }
  0x23   :  { %s1069_s20 = smov [#allocation6]   ;;  %s1037_s26 = scalar_lea.hbm %s1200_s5, 4096 }
  0x24   :  { %s52_s21 = sshll.u32 %s1069_s20, 4  ;;  %p1038_p2 = scmp.ne.s32.totalorder %s1200_s5, %s1037_s26  ;;  %s53_s21 = int_to_ptr.vmem [resolvable:$true] %s52_s21 }
  0x25   :  { %p1041_p3 = scmp.lt.u32.totalorder %s1037_s26, %s1200_s5 }
  0x27   :  { %p1043_p4 = pnand %p1041_p3, %p1038_p2 }
  0x29   :  { %1046 = shalt.err (!%p1043_p4)
}
  0x2a   :  { %s1047_s12 = scalar_lea.vmem %s53_s21, 4096  ;;  %p1052_p6 = scmp.lt.s32.totalorder %s53_s21, %s53_s21 }
  0x2b   :  { %p1048_p5 = scmp.ne.s32.totalorder %s53_s21, %s1047_s12  ;;  %p1053_p7 = scmp.lt.s32.totalorder %s1047_s12, %s1047_s12 }
  0x2d   :  { %p1054_p8 = por %p1053_p7, %p1052_p6 }
  0x2f   :  { %p1055_p9 = pnand %p1054_p8, %p1048_p5 }
  0x31   :  { %1058 = shalt.err (!%p1055_p9)
}
  0x32   :  { %58 = dma.hbm_to_vmem [thread:$0]  %s1200_s5, 4096, %s53_s21, [#allocation5], %s1064_s23, %s1064_s23, %s1065_s24  }
  0x33   :  { %1059 = dma.done.wait [#allocation3], 512  }
  0x34   :  { %1060 = vsyncadd [#allocation3], 4294966784 }
  0x35   :  { %1061 = dma.done.wait [#allocation5], 8192  }
  0x36   :  { %1062 = vsyncadd [#allocation5], 4294959104  ;;  %v1070_v0 = vmov 0   ;;  %vm130_vm0 = vcmask 1045504   ;;  %v896_v5 = vld [vmem:[%s1195_s0] sm:$0xff]   ;;  %vm126_vm1 = vcmask 97280  }
  0x37   :  { %175 = vmatprep.mubr.bf16.mxu0 %v1070_v0  ;;  %218 = vmatprep.mubr.bf16.mxu1 %v1070_v0  ;;  %v890_v1 = vld [vmem:[#allocation2 + $0x4] ss:$16 sps:$4 sm:$0x3f]   ;;  %v892_v2 = vld [vmem:[#allocation2 + $0xc] ss:$16 sps:$4 sm:$0x3f]  }
  0x38   :  { %813 = vmatprep.subr.msk.bf16.mxu0 %vm130_vm0, %v890_v1  ;;  %v894_v3 = vld [vmem:[#allocation2] ss:$16 sps:$4 sm:$0x3f]   ;;  %v895_v4 = vld [vmem:[#allocation2 + $0x8] ss:$16 sps:$4 sm:$0x3f]   ;;  %815 = vmatprep.subr.msk.bf16.mxu1 %vm130_vm0, %v892_v2 }
  0x39   :  { %v132_v6 = vsel %vm130_vm0, %v894_v3, 0  ;;  %v138_v7 = vsel %vm130_vm0, %v895_v4, 0  ;;  %v897_v8 = vld [vmem:[#allocation4] ss:$8 sps:$4 sm:$0xff]   ;;  %v899_v9 = vld [vmem:[#allocation4 + $0x4] ss:$8 sps:$4 sm:$0xff]  }
  0x3a   :  { %144 = vmatpush1.bf16.msra.mxu0 %v132_v6  ;;  %187 = vmatpush1.bf16.msra.mxu1 %v138_v7  ;;  %v900_v10 = vld [vmem:[#allocation6] ss:$8 sps:$4 sm:$0xff]   ;;  %v902_v11 = vld [vmem:[#allocation6 + $0x4] ss:$8 sps:$4 sm:$0xff]   ;;  %v905_v12 = vld [vmem:[#allocation4 + $0x14] ss:$8 sps:$4 sm:$0xff]  }
  0x3b   :  { %443 = vmatprep.subr.bf16.mxu0 %v899_v9  ;;  %v903_v13 = vld [vmem:[#allocation4 + $0x10] ss:$8 sps:$4 sm:$0xff]   ;;  %696 = vmatprep.subr.bf16.mxu1 %v902_v11  ;;  %v908_v14 = vld [vmem:[#allocation6 + $0x14] ss:$8 sps:$4 sm:$0xff]   ;;  %v911_v16 = vld [vmem:[#allocation4 + $0x24] ss:$8 sps:$4 sm:$0xff]  }
  0x3c   :  { %v906_v15 = vld [vmem:[#allocation6 + $0x10] ss:$8 sps:$4 sm:$0xff]   ;;  %v914_v17 = vld [vmem:[#allocation6 + $0x24] ss:$8 sps:$4 sm:$0xff]   ;;  %v909_v18 = vld [vmem:[#allocation4 + $0x20] ss:$8 sps:$4 sm:$0xff]  }
  0x3d   :  { %814 = vmatmul.mubr.msk.bf16.vlgmr.msra.gmra.mrb[0].mxu0 %vm126_vm1, %v896_v5  ;;  %816 = vmatmul.mubr.msk.bf16.vlgmr.msra.gmra.mrb[0].mxu1 %vm126_vm1, %v896_v5  ;;  %v912_v19 = vld [vmem:[#allocation6 + $0x20] ss:$8 sps:$4 sm:$0xff]   ;;  %v917_v20 = vld [vmem:[#allocation4 + $0x34] ss:$8 sps:$4 sm:$0xff]   ;;  %v915_v22 = vld [vmem:[#allocation4 + $0x30] ss:$8 sps:$4 sm:$0xff]  }
  0x3e   :  { %444 = vmatpush1.bf16.msra.mxu0 %v897_v8  ;;  %697 = vmatpush1.bf16.msra.mxu1 %v900_v10  ;;  %v920_v21 = vld [vmem:[#allocation6 + $0x34] ss:$8 sps:$4 sm:$0xff]   ;;  %v918_v23 = vld [vmem:[#allocation6 + $0x30] ss:$8 sps:$4 sm:$0xff]   ;;  %v923_v24 = vld [vmem:[#allocation4 + $0x44] ss:$8 sps:$4 sm:$0xff]   ;;  %v85_v8 = vlaneseq }
  0x3f   :  { %445 = vmatprep.subr.bf16.mxu0 %v905_v12  ;;  %698 = vmatprep.subr.bf16.mxu1 %v908_v14  ;;  %v926_v25 = vld [vmem:[#allocation6 + $0x44] ss:$8 sps:$4 sm:$0xff]   ;;  %v921_v26 = vld [vmem:[#allocation4 + $0x40] ss:$8 sps:$4 sm:$0xff]   ;;  %v929_v28 = vld [vmem:[#allocation4 + $0x54] ss:$8 sps:$4 sm:$0xff]  }
  0x40   :  { %v924_v27 = vld [vmem:[#allocation6 + $0x40] ss:$8 sps:$4 sm:$0xff]   ;;  %v932_v29 = vld [vmem:[#allocation6 + $0x54] ss:$8 sps:$4 sm:$0xff]   ;;  %v927_v30 = vld [vmem:[#allocation4 + $0x50] ss:$8 sps:$4 sm:$0xff]  }
  0x41   :  { %v930_v31 = vld [vmem:[#allocation6 + $0x50] ss:$8 sps:$4 sm:$0xff]   ;;  %v935_v32 = vld [vmem:[#allocation4 + $0x64] ss:$8 sps:$4 sm:$0xff]   ;;  %v933_v34 = vld [vmem:[#allocation4 + $0x60] ss:$8 sps:$4 sm:$0xff]  }
  0x42   :  { %446 = vmatpush1.bf16.msra.mxu0 %v903_v13  ;;  %699 = vmatpush1.bf16.msra.mxu1 %v906_v15  ;;  %v938_v33 = vld [vmem:[#allocation6 + $0x64] ss:$8 sps:$4 sm:$0xff]   ;;  %v936_v35 = vld [vmem:[#allocation6 + $0x60] ss:$8 sps:$4 sm:$0xff]   ;;  %v941_v36 = vld [vmem:[#allocation4 + $0x74] ss:$8 sps:$4 sm:$0xff]  }
  0x43   :  { %447 = vmatprep.subr.bf16.mxu0 %v911_v16  ;;  %700 = vmatprep.subr.bf16.mxu1 %v914_v17  ;;  %v944_v37 = vld [vmem:[#allocation6 + $0x74] ss:$8 sps:$4 sm:$0xff]   ;;  %v939_v38 = vld [vmem:[#allocation4 + $0x70] ss:$8 sps:$4 sm:$0xff]   ;;  %v947_v40 = vld [vmem:[#allocation4 + $0x84] ss:$8 sps:$4 sm:$0xff]  }
  0x44   :  { %v942_v39 = vld [vmem:[#allocation6 + $0x70] ss:$8 sps:$4 sm:$0xff]   ;;  %v950_v41 = vld [vmem:[#allocation6 + $0x84] ss:$8 sps:$4 sm:$0xff]   ;;  %v945_v42 = vld [vmem:[#allocation4 + $0x80] ss:$8 sps:$4 sm:$0xff]  }
  0x45   :  { %v948_v43 = vld [vmem:[#allocation6 + $0x80] ss:$8 sps:$4 sm:$0xff]   ;;  %v953_v44 = vld [vmem:[#allocation4 + $0x94] ss:$8 sps:$4 sm:$0xff]   ;;  %v951_v45 = vld [vmem:[#allocation4 + $0x90] ss:$8 sps:$4 sm:$0xff]  }
  0x46   :  { %448 = vmatpush1.bf16.msra.mxu0 %v909_v18  ;;  %701 = vmatpush1.bf16.msra.mxu1 %v912_v19  ;;  %v956_v46 = vld [vmem:[#allocation6 + $0x94] ss:$8 sps:$4 sm:$0xff]   ;;  %v954_v47 = vld [vmem:[#allocation6 + $0x90] ss:$8 sps:$4 sm:$0xff]   ;;  %v959_v48 = vld [vmem:[#allocation4 + $0xa4] ss:$8 sps:$4 sm:$0xff]  }
  0x47   :  { %449 = vmatprep.subr.bf16.mxu0 %v917_v20  ;;  %702 = vmatprep.subr.bf16.mxu1 %v920_v21  ;;  %v962_v49 = vld [vmem:[#allocation6 + $0xa4] ss:$8 sps:$4 sm:$0xff]   ;;  %v957_v50 = vld [vmem:[#allocation4 + $0xa0] ss:$8 sps:$4 sm:$0xff]   ;;  %v965_v52 = vld [vmem:[#allocation4 + $0xb4] ss:$8 sps:$4 sm:$0xff]  }
  0x48   :  { %v960_v51 = vld [vmem:[#allocation6 + $0xa0] ss:$8 sps:$4 sm:$0xff]   ;;  %v968_v53 = vld [vmem:[#allocation6 + $0xb4] ss:$8 sps:$4 sm:$0xff]   ;;  %v963_v54 = vld [vmem:[#allocation4 + $0xb0] ss:$8 sps:$4 sm:$0xff]  }
  0x49   :  { %v966_v55 = vld [vmem:[#allocation6 + $0xb0] ss:$8 sps:$4 sm:$0xff]   ;;  %v971_v56 = vld [vmem:[#allocation4 + $0xc4] ss:$8 sps:$4 sm:$0xff]   ;;  %v969_v58 = vld [vmem:[#allocation4 + $0xc0] ss:$8 sps:$4 sm:$0xff]  }
  0x4a   :  { %450 = vmatpush1.bf16.msra.mxu0 %v915_v22  ;;  %703 = vmatpush1.bf16.msra.mxu1 %v918_v23  ;;  %v974_v57 = vld [vmem:[#allocation6 + $0xc4] ss:$8 sps:$4 sm:$0xff]   ;;  %v972_v59 = vld [vmem:[#allocation6 + $0xc0] ss:$8 sps:$4 sm:$0xff]   ;;  %v977_v60 = vld [vmem:[#allocation4 + $0xd4] ss:$8 sps:$4 sm:$0xff]  }
  0x4b   :  { %451 = vmatprep.subr.bf16.mxu0 %v923_v24  ;;  %704 = vmatprep.subr.bf16.mxu1 %v926_v25  ;;  %v980_v61 = vld [vmem:[#allocation6 + $0xd4] ss:$8 sps:$4 sm:$0xff]   ;;  %v975_v62 = vld [vmem:[#allocation4 + $0xd0] ss:$8 sps:$4 sm:$0xff]   ;;  %v983_v0 = vld [vmem:[#allocation4 + $0xe4] ss:$8 sps:$4 sm:$0xff]  }
  0x4c   :  { %v978_v63 = vld [vmem:[#allocation6 + $0xd0] ss:$8 sps:$4 sm:$0xff]   ;;  %v986_v1 = vld [vmem:[#allocation6 + $0xe4] ss:$8 sps:$4 sm:$0xff]   ;;  %v981_v2 = vld [vmem:[#allocation4 + $0xe0] ss:$8 sps:$4 sm:$0xff]  }
  0x4d   :  { %v984_v3 = vld [vmem:[#allocation6 + $0xe0] ss:$8 sps:$4 sm:$0xff]   ;;  %v989_v4 = vld [vmem:[#allocation4 + $0xf4] ss:$8 sps:$4 sm:$0xff]   ;;  %v987_v6 = vld [vmem:[#allocation4 + $0xf0] ss:$8 sps:$4 sm:$0xff]  }
  0x4e   :  { %452 = vmatpush1.bf16.msra.mxu0 %v921_v26  ;;  %705 = vmatpush1.bf16.msra.mxu1 %v924_v27  ;;  %v992_v5 = vld [vmem:[#allocation6 + $0xf4] ss:$8 sps:$4 sm:$0xff]   ;;  %v990_v7 = vld [vmem:[#allocation6 + $0xf0] ss:$8 sps:$4 sm:$0xff]   ;;  %v86_v9 = vshrl.u32 %v85_v8, 7  ;;  %vm787_vm2 = vcmask 7168  }
  0x4f   :  { %453 = vmatprep.subr.bf16.mxu0 %v929_v28  ;;  %706 = vmatprep.subr.bf16.mxu1 %v932_v29  ;;  %v83_v12 = vld [vmem:[%s1197_s2] sm:$0xf]  ;;  %vm799_vm3 = vcmask 15360  }
  0x50   :  { %v87_v10 = vsub.s32 0, %v86_v9  ;;  %v95_v11 = vsub.s32 2, %v86_v9  ;;  %v91_v13 = vsub.s32 1, %v86_v9  ;;  %v99_v14 = vsub.s32 3, %v86_v9 }
  0x52   :  { %454 = vmatpush1.bf16.msra.mxu0 %v927_v30  ;;  %707 = vmatpush1.bf16.msra.mxu1 %v930_v31  ;;  %v88_v15 = vrot.slane %v83_v12, %v87_v10  ;;  %v96_v16 = vrot.slane %v83_v12, %v95_v11  ;;  %v92_v17 = vrot.slane %v83_v12, %v91_v13 }
  0x53   :  { %455 = vmatprep.subr.bf16.mxu0 %v935_v32  ;;  %708 = vmatprep.subr.bf16.mxu1 %v938_v33  ;;  %v100_v18 = vrot.slane %v83_v12, %v99_v14 }
  0x56   :  { %456 = vmatpush1.bf16.msra.mxu0 %v933_v34  ;;  %709 = vmatpush1.bf16.msra.mxu1 %v936_v35 }
  0x57   :  { %457 = vmatprep.subr.bf16.mxu0 %v941_v36  ;;  %710 = vmatprep.subr.bf16.mxu1 %v944_v37 }
  0x5a   :  { %458 = vmatpush1.bf16.msra.mxu0 %v939_v38  ;;  %711 = vmatpush1.bf16.msra.mxu1 %v942_v39 }
  0x5b   :  { %459 = vmatprep.subr.bf16.mxu0 %v947_v40  ;;  %712 = vmatprep.subr.bf16.mxu1 %v950_v41 }
  0x5e   :  { %460 = vmatpush1.bf16.msra.mxu0 %v945_v42  ;;  %713 = vmatpush1.bf16.msra.mxu1 %v948_v43 }
  0x5f   :  { %461 = vmatprep.subr.bf16.mxu0 %v953_v44  ;;  %714 = vmatprep.subr.bf16.mxu1 %v956_v46 }
  0x62   :  { %462 = vmatpush1.bf16.msra.mxu0 %v951_v45  ;;  %715 = vmatpush1.bf16.msra.mxu1 %v954_v47  ;;  %v271_v47 = vld [vmem:[%s1199_s4] sm:$0x3] }
  0x63   :  { %463 = vmatprep.subr.bf16.mxu0 %v959_v48  ;;  %716 = vmatprep.subr.bf16.mxu1 %v962_v49  ;;  %v524_v48 = vld [vmem:[%s1201_s6] sm:$0x3]  ;;  %v276_v49 = vrot.slane %v271_v47, %v87_v10 }
  0x66   :  { %464 = vmatpush1.bf16.msra.mxu0 %v957_v50  ;;  %717 = vmatpush1.bf16.msra.mxu1 %v960_v51  ;;  %v529_v50 = vrot.slane %v524_v48, %v87_v10  ;;  %v280_v51 = vrot.slane %v271_v47, %v91_v13 }
  0x67   :  { %465 = vmatprep.subr.bf16.mxu0 %v965_v52  ;;  %718 = vmatprep.subr.bf16.mxu1 %v968_v53  ;;  %v533_v52 = vrot.slane %v524_v48, %v91_v13  ;;  %v743_v53 = vld [vmem:[%s1202_s7] sm:$0x3] }
  0x6a   :  { %466 = vmatpush1.bf16.msra.mxu0 %v963_v54  ;;  %719 = vmatpush1.bf16.msra.mxu1 %v966_v55  ;;  %v765_v54 = vld [vmem:[%s1203_s8] sm:$0x3] }
  0x6b   :  { %467 = vmatprep.subr.bf16.mxu0 %v971_v56  ;;  %720 = vmatprep.subr.bf16.mxu1 %v974_v57 }
  0x6e   :  { %468 = vmatpush1.bf16.msra.mxu0 %v969_v58  ;;  %721 = vmatpush1.bf16.msra.mxu1 %v972_v59 }
  0x6f   :  { %469 = vmatprep.subr.bf16.mxu0 %v977_v60  ;;  %722 = vmatprep.subr.bf16.mxu1 %v980_v61  ;;  %v748_v61 = vrot.slane %v743_v53, %v87_v10 }
  0x72   :  { %470 = vmatpush1.bf16.msra.mxu0 %v975_v62  ;;  %723 = vmatpush1.bf16.msra.mxu1 %v978_v63  ;;  %v770_v62 = vrot.slane %v765_v54, %v87_v10 }
  0x73   :  { %471 = vmatprep.subr.bf16.mxu0 %v983_v0  ;;  %724 = vmatprep.subr.bf16.mxu1 %v986_v1 }
  0x76   :  { %472 = vmatpush1.bf16.msra.mxu0 %v981_v2  ;;  %725 = vmatpush1.bf16.msra.mxu1 %v984_v3  ;;  %v752_v3 = vrot.slane %v743_v53, %v91_v13 }
  0x77   :  { %473 = vmatprep.subr.bf16.mxu0 %v989_v4  ;;  %726 = vmatprep.subr.bf16.mxu1 %v992_v5  ;;  %v774_v4 = vrot.slane %v765_v54, %v91_v13 }
  0x7a   :  { %474 = vmatpush1.bf16.msra.mxu0 %v987_v6  ;;  %727 = vmatpush1.bf16.msra.mxu1 %v990_v7 }
 0x110   :  { %v177_v19 = vpop.f32.mrb[0].mxu0  ;;  %v220_v20 = vpop.f32.mrb[0].mxu1 }
 0x111   :  { %v178_v21 = vadd.f32 %v177_v19, %v88_v15  ;;  %v221_v22 = vadd.f32 %v220_v20, %v96_v16  ;;  %v179_v23 = vpop.f32.mrb[1].mxu0  ;;  %v222_v24 = vpop.f32.mrb[1].mxu1 }
 0x112   :  { %v180_v25 = vadd.f32 %v179_v23, %v92_v17  ;;  %v223_v26 = vadd.f32 %v222_v24, %v100_v18  ;;  %v181_v27 = vpop.f32.mrb[2].mxu0  ;;  %v224_v28 = vpop.f32.mrb[2].mxu1 }
 0x113   :  { %v182_v29 = vadd.f32 %v181_v27, %v88_v15  ;;  %v225_v30 = vadd.f32 %v224_v28, %v96_v16  ;;  %v183_v31 = vpop.f32.mrb[3].mxu0  ;;  %v226_v32 = vpop.f32.mrb[3].mxu1  ;;  %v229_v35 = vmax.f32 %v178_v21, 0.0  ;;  %v231_v36 = vmax.f32 %v221_v22, 0.0 }
 0x114   :  { %v184_v33 = vadd.f32 %v183_v31, %v92_v17  ;;  %v227_v34 = vadd.f32 %v226_v32, %v100_v18  ;;  %v230_v39 = vmax.f32 %v180_v25, 0.0  ;;  %v232_v40 = vmax.f32 %v223_v26, 0.0  ;;  %v881_v31 = vld [vmem:[%s1204_s9] ss:$0 sm:$0xff] }
 0x115   :  { %v233_v37 = vmax.f32 %v182_v29, 0.0  ;;  %v235_v38 = vmax.f32 %v225_v30, 0.0 }
 0x116   :  { %v234_v41 = vmax.f32 %v184_v33, 0.0  ;;  %v236_v42 = vmax.f32 %v227_v34, 0.0 }
 0x117   :  { %v237_v43 = vpack.c.bf16 %v233_v37, %v229_v35  ;;  %v490_v44 = vpack.c.bf16 %v235_v38, %v231_v36 }
 0x118   :  { %v238_v45 = vpack.c.bf16 %v234_v41, %v230_v39  ;;  %v491_v46 = vpack.c.bf16 %v236_v42, %v232_v40 }
 0x11a   :  { %475 = vmatprep.mubr.bf16.mxu0 %v238_v45  ;;  %728 = vmatprep.mubr.bf16.mxu1 %v491_v46 }
 0x11b   :  { %476 = vmatmul.mubr.bf16.vlgmr.msra.gmra.mrb[4].mxu0 %v237_v43  ;;  %729 = vmatmul.mubr.bf16.vlgmr.msra.gmra.mrb[4].mxu1 %v490_v44 }
 0x1ee   :  { %v477_v55 = vpop.f32.mrb[4].mxu0  ;;  %v730_v56 = vpop.f32.mrb[4].mxu1 }
 0x1ef   :  { %v478_v57 = vadd.f32 %v477_v55, %v276_v49  ;;  %v731_v58 = vadd.f32 %v730_v56, %v529_v50  ;;  %v479_v59 = vpop.f32.mrb[5].mxu0  ;;  %v732_v60 = vpop.f32.mrb[5].mxu1 }
 0x1f0   :  { %v480_v63 = vadd.f32 %v479_v59, %v280_v51  ;;  %v733_v0 = vadd.f32 %v732_v60, %v533_v52  ;;  %v481_v1 = vpop.f32.mrb[6].mxu0  ;;  %v734_v2 = vpop.f32.mrb[6].mxu1 }
 0x1f1   :  { %v486_v5 = vmax.f32 %v478_v57, 0.0  ;;  %v739_v6 = vmax.f32 %v731_v58, 0.0  ;;  %v482_v7 = vadd.f32 %v481_v1, %v276_v49  ;;  %v735_v8 = vadd.f32 %v734_v2, %v529_v50  ;;  %v483_v9 = vpop.f32.mrb[7].mxu0  ;;  %v736_v11 = vpop.f32.mrb[7].mxu1 }
 0x1f2   :  { %v487_v12 = vmax.f32 %v480_v63, 0.0  ;;  %v740_v14 = vmax.f32 %v733_v0, 0.0  ;;  %v484_v15 = vadd.f32 %v483_v9, %v280_v51  ;;  %v737_v16 = vadd.f32 %v736_v11, %v533_v52 }
 0x1f3   :  { %v488_v17 = vmax.f32 %v482_v7, 0.0  ;;  %v741_v18 = vmax.f32 %v735_v8, 0.0  ;;  %v777_v19 = vmul.f32 %v770_v62, %v739_v6  ;;  %v755_v10 = vmul.f32 %v748_v61, %v486_v5 }
 0x1f4   :  { %v489_v20 = vmax.f32 %v484_v15, 0.0  ;;  %v742_v21 = vmax.f32 %v737_v16, 0.0  ;;  %v778_v22 = vmul.f32 %v774_v4, %v740_v14  ;;  %v756_v23 = vmul.f32 %v752_v3, %v487_v12 }
 0x1f5   :  { %v757_v24 = vmul.f32 %v748_v61, %v488_v17  ;;  %v779_v13 = vmul.f32 %v770_v62, %v741_v18 }
 0x1f6   :  { %v758_v25 = vmul.f32 %v752_v3, %v489_v20  ;;  %v780_v26 = vmul.f32 %v774_v4, %v742_v21  ;;  %v781_v27 = vadd.f32 %v778_v22, %v777_v19  ;;  %v759_v28 = vadd.f32 %v756_v23, %v755_v10 }
 0x1f8   :  { %782 = vadd.xlane.f32.xlu1 %v781_v27  ;;  %760 = vadd.xlane.f32.xlu0 %v759_v28  ;;  %v784_v29 = vadd.f32 %v780_v26, %v779_v13  ;;  %v762_v30 = vadd.f32 %v758_v25, %v757_v24 }
 0x1fc   :  { %785 = vadd.xlane.f32.xlu1 %v784_v29  ;;  %763 = vadd.xlane.f32.xlu0 %v762_v30 }
 0x285   :  { %v783_v32 = vpop.xlane.xlu1 %782  ;;  %v761_v33 = vpop.xlane.xlu0 %760 }
 0x286   :  { %v788_v34 = vsel %vm787_vm2, %v761_v33, %v783_v32 }
 0x287   :  { %v797_v35 = vadd.f32 %v881_v31, %v788_v34 }
 0x289   :  { %800 = vst.msk [vmem:[%s1205_s10] sm:$0xff] %vm799_vm3, %v797_v35  ;;  %v786_v36 = vpop.xlane.xlu1 %785  ;;  %v764_v37 = vpop.xlane.xlu0 %763 }
 0x28a   :  { %v789_v38 = vsel %vm787_vm2, %v764_v37, %v786_v36 }
 0x28b   :  { %v798_v39 = vadd.f32 %v881_v31, %v789_v38 }
 0x28d   :  { %801 = vst.msk [vmem:[%s1205_s10 + $0x8] sm:$0xff] %vm799_vm3, %v798_v39 }
 0x28e   :  { %806 = vsyncpa [#allocation3], 1 }
 0x28f   :  { %807 = vsyncpa [#allocation5], 1 }

</bundles_post_ra>
